<compile_context>
chip_gen: v7x
topology: tpu7x:2x2x1
jax: 0.10.0
libtpu: 0.0.40
codegen_flags: <defaults>
</compile_context>

<pallas_src>
import functools

import jax
import jax.numpy as jnp
from jax import lax
from jax.experimental import pallas as pl
from jax.experimental.pallas import tpu as pltpu


def _patch_merging_kernel(xe_ref, xo_ref, w_ref, b_ref, o_ref, *,
                          eps, inv_4c, mxu_dtype):
    # xe_ref: even-H rows (h_parity=0), xo_ref: odd-H rows (h_parity=1);
    # each is (tH, W2, 2C) with the lane axis ordered (w_parity, C) so it lines
    # up with the fused weight chunks w_ref[h_parity] of shape (2C, Cout_p).
    rows, cout = o_ref.shape
    th, w2, c2 = xe_ref.shape

    xe = xe_ref[...].astype(jnp.float32).reshape(rows, c2)
    xo = xo_ref[...].astype(jnp.float32).reshape(rows, c2)

    # ---- one-pass LayerNorm stats over the virtual 4C axis (f32) ------------
    s1 = jnp.sum(xe, axis=-1, keepdims=True) + jnp.sum(xo, axis=-1, keepdims=True)
    s2 = (jnp.sum(xe * xe, axis=-1, keepdims=True)
          + jnp.sum(xo * xo, axis=-1, keepdims=True))
    mean = s1 * inv_4c
    var = jnp.maximum(s2 * inv_4c - mean * mean, 0.0)
    inv_std = lax.rsqrt(var + eps)

    # ---- split-K reduction: gamma folded into w_ref, beta folded into b_ref --
    acc = jnp.broadcast_to(b_ref[...], (rows, cout)).astype(jnp.float32)
    acc = acc + jnp.dot(((xe - mean) * inv_std).astype(mxu_dtype), w_ref[0],
                        preferred_element_type=jnp.float32)
    acc = acc + jnp.dot(((xo - mean) * inv_std).astype(mxu_dtype), w_ref[1],
                        preferred_element_type=jnp.float32)
    o_ref[...] = acc.astype(o_ref.dtype)


def patch_merging_pallas(x, gamma, beta, w_reduction, *, input_resolution,
                         eps=1e-5, tile_rows=512, mxu_dtype=jnp.bfloat16,
                         out_dtype=None):
    """PatchMerging forward.

    x            : (B, H*W, C)
    gamma, beta  : (4C,)      LayerNorm affine over 4C
    w_reduction  : (4C, 2C)   == torch `reduction.weight.T` (bias-free Linear)
    returns      : (B, (H//2)*(W//2), 2C)
    """
    H, W = input_resolution
    B, L, C = x.shape
    assert L == H * W, "input feature has wrong size"
    assert H % 2 == 0 and W % 2 == 0, f"x size ({H}*{W}) are not even."
    H2, W2 = H // 2, W // 2
    C4 = 4 * C
    Cout = w_reduction.shape[1]
    assert w_reduction.shape == (C4, Cout)
    out_dtype = x.dtype if out_dtype is None else jnp.dtype(out_dtype)

    # ---- free (contiguous) reshape; the 2x2 gather happens via BlockSpecs ----
    # (B, H*W, C) -> (B, H2, h_par, W2, w_par*C).  No transpose, no HBM copy.
    x5 = x.reshape(B, H2, 2, W2, 2 * C)

    # ---- fold the LN affine into the reduction matmul ------------------------
    w_f = w_reduction.astype(jnp.float32)
    w_fused = gamma.astype(jnp.float32)[:, None] * w_f          # (4C, Cout)
    b_fused = beta.astype(jnp.float32) @ w_f                    # (Cout,)

    # lane-dense output stores: pad Cout to a multiple of 128 only when needed.
    LANE = 128
    cout_p = -(-Cout // LANE) * LANE
    if cout_p != Cout:
        w_fused = jnp.pad(w_fused, ((0, 0), (0, cout_p - Cout)))
        b_fused = jnp.pad(b_fused, (0, cout_p - Cout))

    # torch cat order: 4C chunk k corresponds to (h_par, w_par) = (k % 2, k // 2).
    # Regroup the weight by h_parity so each kernel ref's (w_par, C) lane order
    # multiplies the matching K rows:  W_h = [chunk(w_par=0,h), chunk(w_par=1,h)].
    w4 = w_fused.reshape(4, C, cout_p)
    w_h = jnp.stack(
        [jnp.concatenate([w4[0], w4[2]], axis=0),    # h_par = 0
         jnp.concatenate([w4[1], w4[3]], axis=0)],   # h_par = 1
        axis=0).astype(mxu_dtype)                    # (2, 2C, cout_p)
    b_fused = b_fused.reshape(1, cout_p)

    # ---- row tiling over (B, H2): each step handles tH H-rows x all of W2 ----
    tH = max(1, min(H2, tile_rows // max(W2, 1)))
    # keep the output row block a sublane multiple unless it spans the full axis
    while tH < H2 and (tH * W2) % 8 != 0:
        tH += 1
    nH = pl.cdiv(H2, tH)
    # v7x megacore: make sure there are >= 2 grid steps to shard across 2 TCs.
    if B * nH < 2 and H2 > 1:
        tH = max(1, -(-H2 // 2))
        while tH < H2 and (tH * W2) % 8 != 0:
            tH += 1
        nH = pl.cdiv(H2, tH)

    tile_r = tH * W2
    rows = B * H2 * W2

    # ---- VMEM budget: size from actual buffers, cap at 75% of physical -------
    in_it = x.dtype.itemsize
    out_it = jnp.dtype(out_dtype).itemsize
    w_it = jnp.dtype(mxu_dtype).itemsize
    need = (2 * (tile_r * C4 * in_it)                     # 2 half tiles, double-buffered
            + 2 * (tile_r * cout_p * out_it)              # output tile, double-buffered
            + 2 * (2 * 2 * C * cout_p * w_it + cout_p * 4)  # resident weight + bias
            + tile_r * (C4 + cout_p) * 4                  # in-kernel f32 temporaries
            + (4 << 20))                                  # margin
    try:
        phys_vmem = int(pltpu.get_tpu_info().vmem_capacity_bytes)
    except Exception:
        phys_vmem = 128 * 1024 * 1024
    vmem_limit = int(min(max(need, 32 << 20), (phys_vmem * 3) // 4))

    cost = pl.CostEstimate(
        flops=2 * rows * C4 * cout_p + 10 * rows * C4,    # matmul + LN
        transcendentals=rows,                             # rsqrt per token row
        bytes_accessed=(rows * C4 * in_it
                        + 4 * C * cout_p * w_it + cout_p * 4
                        + rows * cout_p * out_it),
    )

    def hspec(hp):
        # h-parity slab: rows 2*i+hp of H, all W columns, (w_par, C) on lanes.
        return pl.BlockSpec((None, tH, None, W2, 2 * C),
                            lambda b, ih, hp=hp: (b, ih, hp, 0, 0))

    # TODO(synk): on v7x, single-buffer the grid-invariant weight/bias blocks
    # (pipeline_mode=pl.Buffered(1)) to halve their VMEM once that path is
    # validated; they are never re-DMA'd either way since their index is fixed.
    out3 = pl.pallas_call(
        functools.partial(_patch_merging_kernel, eps=eps, inv_4c=1.0 / C4,
                          mxu_dtype=mxu_dtype),
        out_shape=jax.ShapeDtypeStruct((B, H2 * W2, cout_p), out_dtype),
        grid=(B, nH),
        in_specs=[
            hspec(0),                                              # even H rows
            hspec(1),                                              # odd H rows
            pl.BlockSpec((2, 2 * C, cout_p), lambda b, ih: (0, 0, 0)),  # fused weight
            pl.BlockSpec((1, cout_p), lambda b, ih: (0, 0)),            # fused bias
        ],
        out_specs=pl.BlockSpec((None, tile_r, cout_p), lambda b, ih: (b, ih, 0)),
        compiler_params=pltpu.CompilerParams(
            dimension_semantics=("parallel", "parallel"),
            vmem_limit_bytes=vmem_limit,
        ),
        cost_estimate=cost,
    )(x5, x5, w_h, b_fused)

    if cout_p != Cout:
        out3 = out3[..., :Cout]
    return out3


def patch_merging_reference(x, gamma, beta, w_reduction, input_resolution, eps=1e-5):
    """Pure-JAX f32 reference (matches the torch module)."""
    H, W = input_resolution
    B, L, C = x.shape
    xr = x.astype(jnp.float32).reshape(B, H // 2, 2, W // 2, 2, C)
    xm = jnp.transpose(xr, (0, 1, 3, 4, 2, 5)).reshape(
        B, (H // 2) * (W // 2), 4 * C)
    mean = jnp.mean(xm, -1, keepdims=True)
    var = jnp.mean((xm - mean) ** 2, -1, keepdims=True)
    xh = (xm - mean) / jnp.sqrt(var + eps)
    xh = xh * gamma.astype(jnp.float32) + beta.astype(jnp.float32)
    return xh @ w_reduction.astype(jnp.float32)


if __name__ == "__main__":
    # Small shapes consistent with the module: x is (B, H*W, C)
    B, Hs, Ws, dim = 2, 16, 16, 32

    key = jax.random.PRNGKey(0)
    kx, kw, kg, kb = jax.random.split(key, 4)

    x = jax.random.normal(kx, (B, Hs * Ws, dim), dtype=jnp.float32)

    # LayerNorm(4*dim) params (non-trivial, to exercise the affine fold)
    gamma = 1.0 + 0.1 * jax.random.normal(kg, (4 * dim,), jnp.float32)
    beta = 0.05 * jax.random.normal(kb, (4 * dim,), jnp.float32)

    # reduction weight stored as (in=4C, out=2C) = torch reduction.weight.T, bias=False
    w = jax.random.normal(kw, (4 * dim, 2 * dim), jnp.float32) * 0.05

    y = patch_merging_pallas(x, gamma, beta, w, input_resolution=(Hs, Ws))
    y = jax.block_until_ready(y)

    y_ref = patch_merging_reference(x, gamma, beta, w, (Hs, Ws))
    assert y.shape == (B, (Hs // 2) * (Ws // 2), 2 * dim)
    max_err = jnp.max(jnp.abs(y.astype(jnp.float32) - y_ref))
    assert max_err < 3e-2, f"mismatch vs reference: max abs err {max_err}"

    print("KERNEL_OK")
</pallas_src>

<mosaic_0001>
module attributes {stable_mosaic.version = 11 : i64} {
  func.func @_patch_merging_kernel(%arg0: i32, %arg1: i32, %arg2: memref<1x8x1x8x64xf32, #tpu.memory_space<vmem>>, %arg3: memref<1x8x1x8x64xf32, #tpu.memory_space<vmem>>, %arg4: memref<2x64x128xbf16, #tpu.memory_space<vmem>>, %arg5: memref<1x128xf32, #tpu.memory_space<vmem>>, %arg6: memref<1x64x128xf32, #tpu.memory_space<vmem>>) attributes {dimension_semantics = [#tpu.dimension_semantics<parallel>, #tpu.dimension_semantics<parallel>], iteration_bounds = array<i64: 2, 1>, scalar_prefetch = 0 : i64, scratch_operands = 0 : i64, tpu.core_type = #tpu.core_type<tc>, window_params = [{transform_indices = @transform_0, window_bounds = array<i64: 1, 8, 1, 8, 64>}, {transform_indices = @transform_1, window_bounds = array<i64: 1, 8, 1, 8, 64>}, {pipeline_mode = #tpu.pipeline_mode<synchronous>, transform_indices = @transform_2, window_bounds = array<i64: 2, 64, 128>}, {pipeline_mode = #tpu.pipeline_mode<synchronous>, transform_indices = @transform_3, window_bounds = array<i64: 1, 128>}, {transform_indices = @transform_4, window_bounds = array<i64: 1, 64, 128>}]} {
    %c0 = arith.constant 0 : index
    %c0_0 = arith.constant 0 : index
    %c0_1 = arith.constant 0 : index
    %c0_2 = arith.constant 0 : index
    %c0_3 = arith.constant 0 : index
    %0 = vector.load %arg2[%c0, %c0_0, %c0_1, %c0_2, %c0_3] : memref<1x8x1x8x64xf32, #tpu.memory_space<vmem>>, vector<1x8x1x8x64xf32>
    %1 = vector.shape_cast %0 : vector<1x8x1x8x64xf32> to vector<8x8x64xf32>
    %2 = vector.shape_cast %1 : vector<8x8x64xf32> to vector<64x64xf32>
    %c0_4 = arith.constant 0 : index
    %c0_5 = arith.constant 0 : index
    %c0_6 = arith.constant 0 : index
    %c0_7 = arith.constant 0 : index
    %c0_8 = arith.constant 0 : index
    %3 = vector.load %arg3[%c0_4, %c0_5, %c0_6, %c0_7, %c0_8] : memref<1x8x1x8x64xf32, #tpu.memory_space<vmem>>, vector<1x8x1x8x64xf32>
    %4 = vector.shape_cast %3 : vector<1x8x1x8x64xf32> to vector<8x8x64xf32>
    %5 = vector.shape_cast %4 : vector<8x8x64xf32> to vector<64x64xf32>
    %cst = arith.constant dense<0.000000e+00> : vector<64xf32>
    %6 = vector.multi_reduction <add>, %2, %cst [1] : vector<64x64xf32> to vector<64xf32>
    %7 = vector.shape_cast %6 : vector<64xf32> to vector<64x1xf32>
    %cst_9 = arith.constant dense<0.000000e+00> : vector<64xf32>
    %8 = vector.multi_reduction <add>, %5, %cst_9 [1] : vector<64x64xf32> to vector<64xf32>
    %9 = vector.shape_cast %8 : vector<64xf32> to vector<64x1xf32>
    %10 = arith.addf %7, %9 : vector<64x1xf32>
    %11 = arith.mulf %2, %2 : vector<64x64xf32>
    %cst_10 = arith.constant dense<0.000000e+00> : vector<64xf32>
    %12 = vector.multi_reduction <add>, %11, %cst_10 [1] : vector<64x64xf32> to vector<64xf32>
    %13 = vector.shape_cast %12 : vector<64xf32> to vector<64x1xf32>
    %14 = arith.mulf %5, %5 : vector<64x64xf32>
    %cst_11 = arith.constant dense<0.000000e+00> : vector<64xf32>
    %15 = vector.multi_reduction <add>, %14, %cst_11 [1] : vector<64x64xf32> to vector<64xf32>
    %16 = vector.shape_cast %15 : vector<64xf32> to vector<64x1xf32>
    %17 = arith.addf %13, %16 : vector<64x1xf32>
    %cst_12 = arith.constant 7.812500e-03 : f32
    %18 = vector.broadcast %cst_12 : f32 to vector<64x1xf32>
    %19 = arith.mulf %10, %18 : vector<64x1xf32>
    %cst_13 = arith.constant 7.812500e-03 : f32
    %20 = vector.broadcast %cst_13 : f32 to vector<64x1xf32>
    %21 = arith.mulf %17, %20 : vector<64x1xf32>
    %22 = arith.mulf %19, %19 : vector<64x1xf32>
    %23 = arith.subf %21, %22 : vector<64x1xf32>
    %cst_14 = arith.constant 0.000000e+00 : f32
    %24 = vector.broadcast %cst_14 : f32 to vector<64x1xf32>
    %25 = arith.maximumf %23, %24 : vector<64x1xf32>
    %cst_15 = arith.constant 9.99999974E-6 : f32
    %26 = vector.broadcast %cst_15 : f32 to vector<64x1xf32>
    %27 = arith.addf %25, %26 : vector<64x1xf32>
    %28 = math.rsqrt %27 : vector<64x1xf32>
    %c0_16 = arith.constant 0 : index
    %c0_17 = arith.constant 0 : index
    %29 = vector.load %arg5[%c0_16, %c0_17] : memref<1x128xf32, #tpu.memory_space<vmem>>, vector<1x128xf32>
    %30 = vector.shape_cast %29 : vector<1x128xf32> to vector<1x128xf32>
    %31 = vector.broadcast %30 : vector<1x128xf32> to vector<64x128xf32>
    %32 = vector.broadcast %19 : vector<64x1xf32> to vector<64x64xf32>
    %33 = arith.subf %2, %32 : vector<64x64xf32>
    %34 = vector.broadcast %28 : vector<64x1xf32> to vector<64x64xf32>
    %35 = arith.mulf %33, %34 : vector<64x64xf32>
    %36 = arith.truncf %35 : vector<64x64xf32> to vector<64x64xbf16>
    %c0_18 = arith.constant 0 : index
    %c0_19 = arith.constant 0 : index
    %c0_20 = arith.constant 0 : index
    %37 = vector.load %arg4[%c0_18, %c0_19, %c0_20] : memref<2x64x128xbf16, #tpu.memory_space<vmem>>, vector<1x64x128xbf16>
    %38 = vector.shape_cast %37 : vector<1x64x128xbf16> to vector<64x128xbf16>
    %cst_21 = arith.constant dense<0.000000e+00> : vector<64x128xf32>
    %39 = tpu.matmul %36, %38, %cst_21 {dimension_numbers = #tpu.dot_dimension_numbers<[1], [0], [0], [1], [0, 0, 1, 1], [], []>} : vector<64x64xbf16>, vector<64x128xbf16>, vector<64x128xf32> -> vector<64x128xf32>
    %40 = arith.addf %31, %39 : vector<64x128xf32>
    %41 = vector.broadcast %19 : vector<64x1xf32> to vector<64x64xf32>
    %42 = arith.subf %5, %41 : vector<64x64xf32>
    %43 = vector.broadcast %28 : vector<64x1xf32> to vector<64x64xf32>
    %44 = arith.mulf %42, %43 : vector<64x64xf32>
    %45 = arith.truncf %44 : vector<64x64xf32> to vector<64x64xbf16>
    %c1 = arith.constant 1 : index
    %c0_22 = arith.constant 0 : index
    %c0_23 = arith.constant 0 : index
    %46 = vector.load %arg4[%c1, %c0_22, %c0_23] : memref<2x64x128xbf16, #tpu.memory_space<vmem>>, vector<1x64x128xbf16>
    %47 = vector.shape_cast %46 : vector<1x64x128xbf16> to vector<64x128xbf16>
    %cst_24 = arith.constant dense<0.000000e+00> : vector<64x128xf32>
    %48 = tpu.matmul %45, %47, %cst_24 {dimension_numbers = #tpu.dot_dimension_numbers<[1], [0], [0], [1], [0, 0, 1, 1], [], []>} : vector<64x64xbf16>, vector<64x128xbf16>, vector<64x128xf32> -> vector<64x128xf32>
    %49 = arith.addf %40, %48 : vector<64x128xf32>
    %c0_25 = arith.constant 0 : index
    %c0_26 = arith.constant 0 : index
    %c0_27 = arith.constant 0 : index
    %50 = vector.load %arg6[%c0_25, %c0_26, %c0_27] : memref<1x64x128xf32, #tpu.memory_space<vmem>>, vector<1x64x128xf32>
    %51 = vector.shape_cast %50 : vector<1x64x128xf32> to vector<64x128xf32>
    %52 = vector.shape_cast %49 : vector<64x128xf32> to vector<1x64x128xf32>
    tpu.vector_store %arg6[%c0_25, %c0_26, %c0_27], %52 {strides = array<i32>} : memref<1x64x128xf32, #tpu.memory_space<vmem>>, vector<1x64x128xf32>,
    return
  }
  func.func @transform_0(%arg0: i32, %arg1: i32) -> (i32, i32, i32, i32, i32) {
    %c0_i32 = arith.constant 0 : i32
    %c0_i32_0 = arith.constant 0 : i32
    %c0_i32_1 = arith.constant 0 : i32
    %c0_i32_2 = arith.constant 0 : i32
    return %arg0, %arg1, %c0_i32, %c0_i32_0, %c0_i32_1 : i32, i32, i32, i32, i32
  }
  func.func @transform_1(%arg0: i32, %arg1: i32) -> (i32, i32, i32, i32, i32) {
    %c1_i32 = arith.constant 1 : i32
    %c0_i32 = arith.constant 0 : i32
    %c0_i32_0 = arith.constant 0 : i32
    %c0_i32_1 = arith.constant 0 : i32
    return %arg0, %arg1, %c1_i32, %c0_i32, %c0_i32_0 : i32, i32, i32, i32, i32
  }
  func.func @transform_2(%arg0: i32, %arg1: i32) -> (i32, i32, i32) {
    %c0_i32 = arith.constant 0 : i32
    %c0_i32_0 = arith.constant 0 : i32
    %c0_i32_1 = arith.constant 0 : i32
    %c0_i32_2 = arith.constant 0 : i32
    return %c0_i32, %c0_i32_0, %c0_i32_1 : i32, i32, i32
  }
  func.func @transform_3(%arg0: i32, %arg1: i32) -> (i32, i32) {
    %c0_i32 = arith.constant 0 : i32
    %c0_i32_0 = arith.constant 0 : i32
    %c0_i32_1 = arith.constant 0 : i32
    return %c0_i32, %c0_i32_0 : i32, i32
  }
  func.func @transform_4(%arg0: i32, %arg1: i32) -> (i32, i32, i32) {
    %c0_i32 = arith.constant 0 : i32
    %c0_i32_0 = arith.constant 0 : i32
    return %arg0, %arg1, %c0_i32 : i32, i32, i32
  }
}

</mosaic_0001>

<bundles_post_ra>
// kernel: tpu_custom_call.1
= control target key start
LH: loop header
LB: loop body
LE: loop exit
PB: predicated region body
PF: predicated region fallthrough
CT: control target
= control target key end

     0   :  { %s1804_s0 = inlined_call_operand.hbm [shape: f32[2,8,2,8,64], index: 0, kind: input, shape index: {}]   ;;  %s1805_s1 = inlined_call_operand.hbm [shape: f32[2,8,2,8,64], index: 1, kind: input, shape index: {}]   ;;  %s1806_s2 = inlined_call_operand.hbm [shape: bf16[2,64,128], index: 2, kind: input, shape index: {}]   ;;  %s1807_s3 = inlined_call_operand.vmem [shape: f32[1,128], index: 3, kind: input, shape index: {}]   ;;  %s1808_s4 = inlined_call_operand.hbm [shape: f32[2,64,128], index: 4, kind: output, shape index: {}]  }
   0x1   :  { %1817 = sst [smem:[#allocation16_spill]] %s1804_s0 }
   0x2   :  { %1818 = sst [smem:[#allocation17_spill]] %s1806_s2 }
   0x3   :  { %9 = vsyncpa [#allocation3], 0 }
   0x4   :  { %11 = vsyncpa [#allocation3 + $0x1], 0 }
   0x5   :  { %12 = vsyncpa [#allocation6], 0 }
   0x6   :  { %14 = vsyncpa [#allocation6 + $0x1], 0 }
   0x7   :  { %15 = vsyncpa [#allocation4], 0 }
   0x8   :  { %17 = vsyncpa [#allocation4 + $0x1], 0  ;;  %s1360_s15 = smov 0   ;;  %s1362_s16 = smov 0  }
   0x9   :  { %s1364_s17 = smov 0   ;;  %s1366_s18 = smov 0  }
   0xa   :  { %s1368_s19 = smov 0   ;;  %s1370_s20 = smov 0  }
   0xb LB: > { %1819 = sst [smem:[#allocation13_spill]] %s1310_s17  ;;  %s1391_s21 = sadd.s32 4294967295, %s1322_s20   ;;  %s1322_s20 = sphi %s1370_s20, %s23_s20   ;;  %s1318_s19 = sphi %s1368_s19, %s1849_s19   ;;  %s1314_s18 = sphi %s1366_s18, %s1848_s18   ;;  %s1310_s17 = sphi %s1364_s17, %s1844_s17   ;;  %s1306_s16 = sphi %s1362_s16, %s1847_s16   ;;  %s1302_s15 = sphi %s1360_s15, %s1846_s15  }
   0xc   : > { %s930_s22 = sadd.s32 4294967294, %s1322_s20   ;;  %p51_p0 = scmp.ne.s32.totalorder %s1310_s17, %s1306_s16 }
   0xd   : > { %p52_p1 = scmp.eq.s32.totalorder %s1322_s20, 0  ;;  %p57_p2 = scmp.ne.s32.totalorder %s1306_s16, %s1302_s15 }
   0xe   : > { %p1809_p3 = scmp.eq.s32.totalorder %s1391_s21, 0  ;;  %p153_p4 = scmp.eq.s32.totalorder %s1391_s21, 1 }
   0xf   : > { %p1402_p5 = por %p52_p1, %p51_p0  ;;  %p159_p6 = scmp.eq.s32.totalorder %s930_s22, 1 }
  0x10   : > { %p1408_p7 = por %p1809_p3, %p57_p2  ;;  %p1412_p8 = por %p153_p4, %p51_p0 }
  0x11   : > { %p1416_p9 = por %p159_p6, %p57_p2  ;;  %p931_p10 = scmp.ge.s32.totalorder %s1322_s20, 1 }
  0x12   : > { %s1821_s25 = scalar_select %p1408_p7, 1, 0 }
  0x13   : > { %s1822_s26 = scalar_select %p1412_p8, 1, 0 }
  0x14   : > { %s1823_s27 = scalar_select %p1416_p9, 1, 0 }
  0x15   : > { %p166_p11 = scmp.lt.s32.totalorder %s1322_s20, 3  ;;  %s1324_s29 = smov [#allocation7]  }
  0x16   : > { %s178_s30 = sshll.u32 %s1324_s29, 4  ;;  %p1060_p1 = scmp.lt.s32.totalorder %s1322_s20, 2  ;;  %s1426_s30 = int_to_ptr.vmem [resolvable:$true] %s178_s30 }
  0x17   : > { %p1422_p12 = pnand %p931_p10, %p166_p11  ;;  %s35_s7 = sadd.s32 1, %s1318_s19 }
  0x18   : > { %p1440_p4 = pnand %p1060_p1, %p1402_p5  ;;  %p1445_p6 = scmp.ge.s32.totalorder %s35_s7, 2 }
  0x19   : > { %s1824_s28 = scalar_select %p1422_p12, 1, 0 }
  0x1a   : > { %p1044_p13 = pneg %p1422_p12  ;;  %s1828_s2 = sld [smem:[#allocation17_spill]] }
  0x1b   : > { %s1826_s6 = scalar_select %p1440_p4, 1, 0 }
  0x1c   : > { %p1434_p2 = pnand %p1044_p13, %p1809_p3 }
  0x1d   : > { %s1827_s8 = scalar_select %p1445_p6, 1, 0 }
  0x1e   : > { %p1145_p11 = pneg %p1434_p2 }
  0x20   : > { %s1143_s11 = scalar_lea.hbm %s1828_s2, 1024 }
  0x21   : > { %p1144_p10 = scmp.ne.s32.totalorder %s1828_s2, %s1143_s11  ;;  %p1150_p1 = scmp.lt.u32.totalorder %s1143_s11, %s1828_s2 }
  0x23   : > { %p1146_p13 = pnand %p1145_p11, %p1144_p10 }
  0x25   : > { %p1147_p5 = pneg %p1146_p13 }
  0x27   : > { %p1152_p0 = pnand %p1150_p1, %p1147_p5 }
  0x29   : > { %1155 = shalt.err (!%p1152_p0)
}
  0x2a   : > { %s1156_s24 = scalar_lea.vmem %s1426_s30, 1024  ;;  %p1164_p7 = scmp.lt.s32.totalorder %s1426_s30, %s1426_s30 }
  0x2b   : > { %p1157_p3 = scmp.ne.s32.totalorder %s1426_s30, %s1156_s24  ;;  %p1165_p12 = scmp.lt.s32.totalorder %s1156_s24, %s1156_s24 }
  0x2d   : > { %p1159_p9 = pnand %p1157_p3, %p1145_p11  ;;  %p1166_p4 = por %p1165_p12, %p1164_p7 }
  0x2f   : > { %p1160_p8 = pneg %p1159_p9 }
  0x31   : > { %p1167_p6 = pnand %p1166_p4, %p1160_p8 }
  0x33   : > { %1170 = shalt.err (!%p1167_p6)
}
  0x34   : > { %s1325_s29 = smov 64   ;;  %s1326_s9 = smov 4  }
  0x35   : > { %1047 = dma.hbm_to_vmem [thread:$0]  (!%p1434_p2), %s1828_s2, 1024, %s1426_s30, [#allocation6], %s1325_s29, %s1325_s29, %s1326_s9  }
  0x36   : > { %s195_s12 = sand.u32 1, %s1310_s17   ;;  %p1829_p3 = scmp.ne.s32.totalorder %s1827_s8, 0 }
  0x37   : > { %s1475_s13 = sshll.u32 %s195_s12, 6  ;;  %s1814_s22 = sshll.u32 %s1318_s19, 11 }
  0x38   : > { %s1851_s7 = smov (%p1829_p3, %s35_s7), 0  ;;  %s1831_s0 = sld [smem:[#allocation16_spill]] }
  0x39   : > { %1830 = sst [smem:[#allocation14_spill]] %s1851_s7  ;;  %s39_s14 = ssub.s32 %s1318_s19, %s1851_s7 }
  0x3a   : > { %p42_p7 = scmp.eq.s32.totalorder %s39_s14, 0  ;;  %s199_s30 = scalar_lea.vmem [#allocation2], %s1475_s13 }
  0x3b   : > { %s209_s8 = sshll.u32 %s199_s30, 4  ;;  %s1832_s29 = sadd.s32 1, %s1310_s17  ;;  %s1493_s8 = int_to_ptr.vmem [resolvable:$true] %s209_s8 }
  0x3c   : > { %s1491_s9 = scalar_select %p42_p7, %s1310_s17, %s1832_s29  }
  0x3d   : > { %s1495_s10 = scalar_lea.sflag [#allocation3], %s195_s12  ;;  %p1834_p9 = scmp.ne.s32.totalorder %s1826_s6, 0 }
  0x3e   : > { %s1485_s23 = scalar_lea.hbm %s1831_s0, %s1814_s22  ;;  %1833 = sst [smem:[#allocation15_spill]] %s1491_s9 }
  0x3f   : > { %s1171_s11 = scalar_lea.hbm %s1485_s23, 1024  ;;  %p1173_p12 = pneg %p1834_p9 }
  0x40   : > { %p1172_p8 = scmp.ne.s32.totalorder %s1485_s23, %s1171_s11  ;;  %s1176_s5 = scalar_lea.hbm %s1831_s0, 4096 }
  0x41   : > { %p1177_p4 = scmp.lt.u32.totalorder %s1485_s23, %s1831_s0  ;;  %p1178_p6 = scmp.lt.u32.totalorder %s1176_s5, %s1171_s11 }
  0x42   : > { %p1174_p0 = pnand %p1173_p12, %p1172_p8  ;;  %p1180_p11 = scmp.lt.u32.totalorder %s1171_s11, %s1485_s23 }
  0x43   : > { %p1179_p10 = por %p1178_p6, %p1177_p4 }
  0x44   : > { %p1175_p2 = pneg %p1174_p0 }
  0x45   : > { %p1181_p13 = por %p1180_p11, %p1179_p10 }
  0x47   : > { %p1182_p5 = pnand %p1181_p13, %p1175_p2 }
  0x49   : > { %1185 = shalt.err (!%p1182_p5)
}
  0x4a   : > { %s1186_s12 = scalar_lea.vmem %s1493_s8, 1024  ;;  %s1327_s29 = smov [#allocation2]  }
  0x4b   : > { %p1187_p1 = scmp.ne.s32.totalorder %s1493_s8, %s1186_s12  ;;  %s1191_s14 = sshll.u32 %s1327_s29, 4  ;;  %s1192_s14 = int_to_ptr.vmem [resolvable:$false] %s1191_s14 }
  0x4c   : > { %s1193_s22 = scalar_lea.vmem %s1192_s14, 2048  ;;  %p1194_p8 = scmp.lt.s32.totalorder %s1493_s8, %s1192_s14 }
  0x4d   : > { %p1189_p3 = pnand %p1187_p1, %p1173_p12  ;;  %p1195_p0 = scmp.lt.s32.totalorder %s1193_s22, %s1186_s12 }
  0x4f   : > { %p1190_p7 = pneg %p1189_p3  ;;  %p1196_p4 = por %p1195_p0, %p1194_p8 }
  0x51   : > { %p1197_p6 = pnand %p1196_p4, %p1190_p7 }
  0x53   : > { %1200 = shalt.err (!%p1197_p6)
}
  0x54   : > { %s1328_s11 = smov 256   ;;  %s1329_s24 = smov 128  }
  0x55   : > { %s1330_s5 = smov 8   ;;  %s1835_s30 = sshll.u32 %s1318_s19, 11 }
  0x56   : > { %1051 = dma.hbm_to_vmem [thread:$0]  (!%p1834_p9), %s1485_s23, 1024, %s1493_s8, %s1495_s10, %s1328_s11, %s1329_s24, %s1330_s5  }
  0x57   : > { %s851_s14 = scalar_lea.hbm %s1805_s1, %s1835_s30  ;;  %s223_s0 = scalar_lea.vmem [#allocation5], %s1475_s13 }
  0x58   : > { %s1531_s22 = scalar_lea.hbm %s851_s14, 128  ;;  %s234_s2 = sshll.u32 %s223_s0, 4  ;;  %s1534_s2 = int_to_ptr.vmem [resolvable:$true] %s234_s2 }
  0x59   : > { %s219_s7 = sand.u32 1, %s1322_s20   ;;  %s1231_s17 = scalar_lea.hbm %s851_s14, 1152 }
  0x5a   : > { %s1537_s9 = scalar_lea.sflag [#allocation6], %s219_s7  ;;  %p1202_p2 = scmp.ne.s32.totalorder %s1531_s22, %s1231_s17 }
  0x5b   : > { %s1206_s10 = scalar_lea.hbm %s1805_s1, 4096  ;;  %p1207_p13 = scmp.lt.u32.totalorder %s1531_s22, %s1805_s1 }
  0x5c   : > { %p1204_p10 = pnand %p1202_p2, %p1173_p12  ;;  %p1208_p5 = scmp.lt.u32.totalorder %s1206_s10, %s1231_s17 }
  0x5d   : > { %p1210_p3 = scmp.lt.u32.totalorder %s1231_s17, %s1531_s22 }
  0x5e   : > { %p1205_p11 = pneg %p1204_p10  ;;  %p1209_p1 = por %p1208_p5, %p1207_p13 }
  0x60   : > { %p1211_p7 = por %p1210_p3, %p1209_p1 }
  0x62   : > { %p1212_p8 = pnand %p1211_p7, %p1205_p11 }
  0x64   : > { %1215 = shalt.err (!%p1212_p8)
}
  0x65   : > { %s1216_s0 = scalar_lea.vmem %s1534_s2, 1024  ;;  %s1331_s7 = smov [#allocation5]  }
  0x66   : > { %p1217_p0 = scmp.ne.s32.totalorder %s1534_s2, %s1216_s0  ;;  %s1221_s13 = sshll.u32 %s1331_s7, 4  ;;  %s1222_s13 = int_to_ptr.vmem [resolvable:$false] %s1221_s13 }
  0x67   : > { %s1223_s29 = scalar_lea.vmem %s1222_s13, 2048  ;;  %p1224_p2 = scmp.lt.s32.totalorder %s1534_s2, %s1222_s13 }
  0x68   : > { %p1219_p4 = pnand %p1217_p0, %p1173_p12  ;;  %p1225_p10 = scmp.lt.s32.totalorder %s1223_s29, %s1216_s0 }
  0x6a   : > { %p1220_p6 = pneg %p1219_p4  ;;  %p1226_p13 = por %p1225_p10, %p1224_p2 }
  0x6c   : > { %p1227_p5 = pnand %p1226_p13, %p1220_p6 }
  0x6e   : > { %1230 = shalt.err (!%p1227_p5)
}
  0x6f   : > { %1054 = dma.hbm_to_vmem [thread:$0]  (!%p1834_p9), %s1531_s22, 1024, %s1534_s2, %s1537_s9, %s1328_s11, %s1329_s24, %s1330_s5  }
  0x70   : > { %p1836_p12 = scmp.ne.s32.totalorder %s1824_s28, 0 }
  0x71   : > { %s1568_s17 = sand.u32 (!%p1836_p12), 1, %s1306_s16   ;;  %p1837_p11 = scmp.ne.s32.totalorder (!%p1836_p12), %s1821_s25, 0 }
  0x72   : > { %246 = sbr.rel (%p1836_p12) target bundleno = 592 (0x250), region = 36  ;;  %s1571_s14 = sshll.u32 (!%p1836_p12), %s1568_s17, 6 }
  0x73   : > { %s249_s6 = scalar_lea.sflag (!%p1836_p12), [#allocation3], %s1568_s17  ;;  %s1575_s23 = scalar_lea.vmem (!%p1836_p12), [#allocation2], %s1571_s14 }
  0x79   : > { %1285 = dma.done.wait (%p1837_p11), %s249_s6, 1024  }
  0x7a   : > { %1287 = vsyncadd (%p1837_p11), %s249_s6, 4294966272  ;;  %s257_s2 = sand.u32 1, %s1391_s21   ;;  %s1583_s9 = scalar_lea.vmem [#allocation5], %s1571_s14 }
  0x7b   : > { %s258_s28 = scalar_lea.sflag [#allocation6], %s257_s2 }
  0x7c   : > { %1289 = dma.done.wait (%p1837_p11), %s258_s28, 1024  }
  0x7d   : > { %1291 = vsyncadd (%p1837_p11), %s258_s28, 4294966272  ;;  %p1838_p9 = scmp.eq.s32.totalorder %s1391_s21, 0 }
  0x7f   : > { %1293 = dma.done.wait (%p1838_p9), [#allocation6], 1024   ;;  %p1839_p1 = pmov %p1838_p9 }
  0x80   : > { %vm315_vm0 = vcmask 523264   ;;  %v1594_v0 = vld [vmem:[%s1583_s9] sm:$0xff]  ;;  %v1600_v2 = vld [vmem:[%s1583_s9 + $0x8] sm:$0xff]  ;;  %v1614_v8 = vld [vmem:[%s1575_s23 + $0x18] sm:$0xff]  ;;  %s294_s11 = scalar_lea.vmem [#allocation8], %s1571_s14  ;;  %s969_s5 = sshll.u32 %s1314_s18, 10 }
  0x81   : > { %1295 = vsyncadd (%p1839_p1), [#allocation6], 4294966272  ;;  %v1597_v1 = vld [vmem:[%s1575_s23] sm:$0xff]  ;;  %v340_v3 = vsel %vm315_vm0, %v1594_v0, 0.0  ;;  %v1607_v5 = vld [vmem:[%s1575_s23 + $0x8] sm:$0xff]  ;;  %v343_v6 = vsel %vm315_vm0, %v1600_v2, 0.0  ;;  %v405_v20 = vmul.f32 %v1600_v2, %v1600_v2  ;;  %v404_v21 = vmul.f32 %v1594_v0, %v1594_v0  ;;  %s1755_s10 = scalar_lea.hbm %s1808_s4, %s969_s5 }
  0x82   : > { %v316_v4 = vsel %vm315_vm0, %v1597_v1, 0.0  ;;  %341 = vadd.xlane.f32.xlu1 %v340_v3  ;;  %v319_v7 = vsel %vm315_vm0, %v1607_v5, 0.0  ;;  %v1617_v9 = vld [vmem:[%s1575_s23 + $0x10] sm:$0xff]  ;;  %v325_v10 = vsel %vm315_vm0, %v1614_v8, 0.0  ;;  %v1624_v12 = vld [vmem:[%s1583_s9 + $0x18] sm:$0xff]  ;;  %v373_v16 = vmul.f32 %v1607_v5, %v1607_v5  ;;  %v1658_v32 = vld [vmem:[%s1575_s23 + $0x28] sm:$0xff] }
  0x83   : > { %317 = vadd.xlane.f32.xlu0 %v316_v4  ;;  %v322_v11 = vsel %vm315_vm0, %v1617_v9, 0.0  ;;  %v1627_v13 = vld [vmem:[%s1583_s9 + $0x10] sm:$0xff]  ;;  %v349_v14 = vsel %vm315_vm0, %v1624_v12, 0.0  ;;  %v372_v17 = vmul.f32 %v1597_v1, %v1597_v1  ;;  %v415_v22 = vsel %vm315_vm0, %v405_v20, 0.0  ;;  %v1661_v33 = vld [vmem:[%s1575_s23 + $0x20] sm:$0xff]  ;;  %v1668_v36 = vld [vmem:[%s1583_s9 + $0x28] sm:$0xff] }
  0x84   : > { %v346_v15 = vsel %vm315_vm0, %v1627_v13, 0.0  ;;  %v383_v18 = vsel %vm315_vm0, %v373_v16, 0.0  ;;  %v412_v23 = vsel %vm315_vm0, %v404_v21, 0.0  ;;  %v375_v24 = vmul.f32 %v1614_v8, %v1614_v8  ;;  %v1671_v37 = vld [vmem:[%s1583_s9 + $0x20] sm:$0xff]  ;;  %v1678_v40 = vld [vmem:[%s1575_s23 + $0x38] sm:$0xff]  ;;  %v1681_v41 = vld [vmem:[%s1575_s23 + $0x30] sm:$0xff] }
  0x85   : > { %v380_v19 = vsel %vm315_vm0, %v372_v17, 0.0  ;;  %v374_v25 = vmul.f32 %v1617_v9, %v1617_v9  ;;  %v407_v28 = vmul.f32 %v1624_v12, %v1624_v12  ;;  %v406_v29 = vmul.f32 %v1627_v13, %v1627_v13  ;;  %v1688_v44 = vld [vmem:[%s1583_s9 + $0x38] sm:$0xff]  ;;  %v1691_v45 = vld [vmem:[%s1583_s9 + $0x30] sm:$0xff]  ;;  %v1119_v58 = vld [vmem:[#allocation7] sm:$0xff]   ;;  %s806_s24 = sshll.u32 %s294_s11, 4  ;;  %s791_s18 = scalar_lea.sflag [#allocation4], %s1568_s17  ;;  %s1750_s24 = int_to_ptr.vmem [resolvable:$true] %s806_s24 }
  0x86   : > { %344 = vadd.xlane.f32.xlu1 %v343_v6  ;;  %v389_v26 = vsel %vm315_vm0, %v375_v24, 0.0  ;;  %v331_v34 = vsel %vm315_vm0, %v1658_v32, 0.0  ;;  %v328_v35 = vsel %vm315_vm0, %v1661_v33, 0.0  ;;  %v355_v38 = vsel %vm315_vm0, %v1668_v36, 0.0  ;;  %v1120_v59 = vld [vmem:[#allocation7 + $0x20] sm:$0xff]   ;;  %986 = vmatprep.subr.bf16.mxu1 %v1119_v58  ;;  %v1121_v3 = vld [vmem:[#allocation7 + $0x8] sm:$0xff]  }
  0x87   : > { %320 = vadd.xlane.f32.xlu0 %v319_v7  ;;  %v386_v27 = vsel %vm315_vm0, %v374_v25, 0.0  ;;  %v421_v30 = vsel %vm315_vm0, %v407_v28, 0.0  ;;  %v418_v31 = vsel %vm315_vm0, %v406_v29, 0.0  ;;  %v352_v39 = vsel %vm315_vm0, %v1671_v37, 0.0  ;;  %1002 = vmatprep.subr.bf16.mxu0 %v1120_v59  ;;  %v1122_v4 = vld [vmem:[#allocation7 + $0x28] sm:$0xff]   ;;  %s1232_s30 = scalar_lea.vmem %s1750_s24, 1024 }
  0x88   : > { %v337_v42 = vsel %vm315_vm0, %v1678_v40, 0.0  ;;  %v334_v43 = vsel %vm315_vm0, %v1681_v41, 0.0  ;;  %v361_v46 = vsel %vm315_vm0, %v1688_v44, 0.0  ;;  %v358_v47 = vsel %vm315_vm0, %v1691_v45, 0.0  ;;  %987 = vmatpush3.bf16.msra.mxu1 %v1119_v58  ;;  %1003 = vmatpush3.bf16.msra.mxu0 %v1120_v59  ;;  %p1233_p3 = scmp.ne.s32.totalorder %s1750_s24, %s1232_s30  ;;  %p1840_p7 = scmp.ne.s32.totalorder %s1822_s26, 0 }
  0x89   : > { %v377_v48 = vmul.f32 %v1658_v32, %v1658_v32  ;;  %v376_v49 = vmul.f32 %v1661_v33, %v1661_v33  ;;  %v409_v52 = vmul.f32 %v1668_v36, %v1668_v36  ;;  %v408_v53 = vmul.f32 %v1671_v37, %v1671_v37  ;;  %988 = vmatprep.subr.bf16.mxu1 %v1121_v3  ;;  %s1332_s12 = smov [#allocation8]  }
  0x8a   : > { %326 = vadd.xlane.f32.xlu1 %v325_v10  ;;  %v379_v56 = vmul.f32 %v1678_v40, %v1678_v40  ;;  %v378_v57 = vmul.f32 %v1681_v41, %v1681_v41  ;;  %v411_v62 = vmul.f32 %v1688_v44, %v1688_v44  ;;  %v410_v63 = vmul.f32 %v1691_v45, %v1691_v45  ;;  %v1123_v10 = vld [vmem:[#allocation7 + $0x10] sm:$0xff]   ;;  %p1234_p8 = pnand %p1233_p3, %p1840_p7  ;;  %s1236_s0 = sshll.u32 %s1332_s12, 4  ;;  %s1237_s0 = int_to_ptr.vmem [resolvable:$false] %s1236_s0 }
  0x8b   : > { %323 = vadd.xlane.f32.xlu0 %v322_v11  ;;  %v395_v50 = vsel %vm315_vm0, %v377_v48, 0.0  ;;  %v392_v51 = vsel %vm315_vm0, %v376_v49, 0.0  ;;  %v427_v54 = vsel %vm315_vm0, %v409_v52, 0.0  ;;  %v424_v55 = vsel %vm315_vm0, %v408_v53, 0.0  ;;  %1004 = vmatprep.subr.bf16.mxu0 %v1122_v4  ;;  %v1124_v11 = vld [vmem:[#allocation7 + $0x30] sm:$0xff]   ;;  %s1238_s7 = scalar_lea.vmem %s1237_s0, 2048  ;;  %p1239_p4 = scmp.lt.s32.totalorder %s1750_s24, %s1237_s0 }
  0x8c   : > { %v401_v60 = vsel %vm315_vm0, %v379_v56, 0.0  ;;  %v398_v61 = vsel %vm315_vm0, %v378_v57, 0.0  ;;  %v433_v6 = vsel %vm315_vm0, %v411_v62, 0.0  ;;  %v430_v7 = vsel %vm315_vm0, %v410_v63, 0.0  ;;  %989 = vmatpush3.bf16.msra.mxu1 %v1121_v3  ;;  %1005 = vmatpush3.bf16.msra.mxu0 %v1122_v4  ;;  %p1235_p0 = pneg %p1234_p8  ;;  %p1240_p6 = scmp.lt.s32.totalorder %s1238_s7, %s1232_s30 }
  0x8d   : > { %990 = vmatprep.subr.bf16.mxu1 %v1123_v10  ;;  %1006 = vmatprep.subr.bf16.mxu0 %v1124_v11 }
  0x8e   : > { %350 = vadd.xlane.f32.xlu1 %v349_v14  ;;  %v1125_v14 = vld [vmem:[#allocation7 + $0x18] sm:$0xff]   ;;  %p1241_p2 = por %p1240_p6, %p1239_p4 }
  0x8f   : > { %347 = vadd.xlane.f32.xlu0 %v346_v15  ;;  %v1126_v15 = vld [vmem:[#allocation7 + $0x38] sm:$0xff]  }
  0x90   : > { %991 = vmatpush3.bf16.msra.mxu1 %v1123_v10  ;;  %1007 = vmatpush3.bf16.msra.mxu0 %v1124_v11  ;;  %p1242_p10 = pnand %p1241_p2, %p1235_p0 }
  0x91   : > { %992 = vmatprep.subr.bf16.mxu1 %v1125_v14  ;;  %1008 = vmatprep.subr.bf16.mxu0 %v1126_v15 }
  0x92   : > { %384 = vadd.xlane.f32.xlu1 %v383_v18 }
  0x93   : > { %381 = vadd.xlane.f32.xlu0 %v380_v19 }
  0x94   : > { %993 = vmatpush3.bf16.msra.mxu1 %v1125_v14  ;;  %1009 = vmatpush3.bf16.msra.mxu0 %v1126_v15 }
  0x96   : > { %416 = vadd.xlane.f32.xlu1 %v415_v22 }
  0x97   : > { %413 = vadd.xlane.f32.xlu0 %v412_v23 }
  0x9a   : > { %390 = vadd.xlane.f32.xlu1 %v389_v26 }
  0x9b   : > { %387 = vadd.xlane.f32.xlu0 %v386_v27 }
  0x9e   : > { %422 = vadd.xlane.f32.xlu1 %v421_v30 }
  0x9f   : > { %419 = vadd.xlane.f32.xlu0 %v418_v31 }
  0xa2   : > { %332 = vadd.xlane.f32.xlu1 %v331_v34 }
  0xa3   : > { %329 = vadd.xlane.f32.xlu0 %v328_v35 }
  0xa6   : > { %356 = vadd.xlane.f32.xlu1 %v355_v38 }
  0xa7   : > { %353 = vadd.xlane.f32.xlu0 %v352_v39 }
  0xaa   : > { %338 = vadd.xlane.f32.xlu1 %v337_v42 }
  0xab   : > { %335 = vadd.xlane.f32.xlu0 %v334_v43 }
  0xae   : > { %362 = vadd.xlane.f32.xlu1 %v361_v46 }
  0xaf   : > { %359 = vadd.xlane.f32.xlu0 %v358_v47 }
  0xb2   : > { %396 = vadd.xlane.f32.xlu1 %v395_v50 }
  0xb3   : > { %393 = vadd.xlane.f32.xlu0 %v392_v51 }
  0xb6   : > { %428 = vadd.xlane.f32.xlu1 %v427_v54 }
  0xb7   : > { %425 = vadd.xlane.f32.xlu0 %v424_v55 }
  0xba   : > { %402 = vadd.xlane.f32.xlu1 %v401_v60 }
  0xbb   : > { %399 = vadd.xlane.f32.xlu0 %v398_v61 }
  0xbe   : > { %434 = vadd.xlane.f32.xlu1 %v433_v6 }
  0xbf   : > { %431 = vadd.xlane.f32.xlu0 %v430_v7 }
 0x10f   : > { %v342_v16 = vpop.xlane.xlu1 %341 }
 0x110   : > { %v318_v17 = vpop.xlane.xlu0 %317 }
 0x111   : > { %v364_v24 = vadd.f32 %v342_v16, %v318_v17 }
 0x113   : > { %v345_v18 = vpop.xlane.xlu1 %344  ;;  %v444_v28 = vmul.f32 0.0078125, %v364_v24 }
 0x114   : > { %v321_v19 = vpop.xlane.xlu0 %320 }
 0x115   : > { %v365_v25 = vadd.f32 %v345_v18, %v321_v19  ;;  %v460_v39 = vmul.f32 %v444_v28, %v444_v28 }
 0x117   : > { %v327_v20 = vpop.xlane.xlu1 %326  ;;  %v445_v29 = vmul.f32 0.0078125, %v365_v25  ;;  %v507_v25 = vsub.f32 %v1597_v1, %v444_v28 }
 0x118   : > { %v324_v21 = vpop.xlane.xlu0 %323 }
 0x119   : > { %v461_v46 = vmul.f32 %v445_v29, %v445_v29 }
 0x11b   : > { %v351_v22 = vpop.xlane.xlu1 %350 }
 0x11c   : > { %v348_v23 = vpop.xlane.xlu0 %347  ;;  %v367_v38 = vadd.f32 %v351_v22, %v327_v20  ;;  %v508_v22 = vsub.f32 %v1607_v5, %v445_v29 }
 0x11d   : > { %v366_v42 = vadd.f32 %v348_v23, %v324_v21  ;;  %v645_v23 = vsub.f32 %v1600_v2, %v445_v29 }
 0x11e   : > { %v447_v52 = vmul.f32 0.0078125, %v367_v38 }
 0x11f   : > { %v385_v26 = vpop.xlane.xlu1 %384  ;;  %v446_v53 = vmul.f32 0.0078125, %v366_v42 }
 0x120   : > { %v382_v27 = vpop.xlane.xlu0 %381  ;;  %v463_v62 = vmul.f32 %v447_v52, %v447_v52  ;;  %v510_v2 = vsub.f32 %v1614_v8, %v447_v52  ;;  %v647_v1 = vsub.f32 %v1624_v12, %v447_v52 }
 0x121   : > { %v462_v3 = vmul.f32 %v446_v53, %v446_v53  ;;  %v509_v29 = vsub.f32 %v1617_v9, %v446_v53 }
 0x123   : > { %v417_v30 = vpop.xlane.xlu1 %416 }
 0x124   : > { %v414_v31 = vpop.xlane.xlu0 %413  ;;  %v437_v34 = vadd.f32 %v417_v30, %v385_v26  ;;  %v644_v26 = vsub.f32 %v1594_v0, %v444_v28 }
 0x125   : > { %v436_v35 = vadd.f32 %v414_v31, %v382_v27 }
 0x126   : > { %v453_v43 = vmul.f32 0.0078125, %v437_v34 }
 0x127   : > { %v452_v47 = vmul.f32 0.0078125, %v436_v35  ;;  %v391_v48 = vpop.xlane.xlu1 %390 }
 0x128   : > { %v388_v49 = vpop.xlane.xlu0 %387  ;;  %v469_v50 = vsub.f32 %v453_v43, %v461_v46 }
 0x129   : > { %v468_v51 = vsub.f32 %v452_v47, %v460_v39 }
 0x12a   : > { %v477_v54 = vmax.f32 %v469_v50, 0.0 }
 0x12b   : > { %v476_v55 = vmax.f32 %v468_v51, 0.0  ;;  %v423_v56 = vpop.xlane.xlu1 %422 }
 0x12c   : > { %v420_v57 = vpop.xlane.xlu0 %419  ;;  %v485_v58 = vadd.f32 1e-05, %v477_v54  ;;  %v439_v60 = vadd.f32 %v423_v56, %v391_v48  ;;  %v646_v48 = vsub.f32 %v1627_v13, %v446_v53 }
 0x12d   : > { %v484_v59 = vadd.f32 1e-05, %v476_v55  ;;  %v438_v61 = vadd.f32 %v420_v57, %v388_v49 }
 0x12e   : > { %1127 = vrsqrt.f32 %v485_v58  ;;  %v455_v63 = vmul.f32 0.0078125, %v439_v60 }
 0x12f   : > { %v454_v4 = vmul.f32 0.0078125, %v438_v61  ;;  %1129 = vrsqrt.f32 %v484_v59  ;;  %v333_v6 = vpop.xlane.xlu1 %332 }
 0x130   : > { %v330_v7 = vpop.xlane.xlu0 %329  ;;  %v471_v10 = vsub.f32 %v455_v63, %v463_v62 }
 0x131   : > { %v470_v11 = vsub.f32 %v454_v4, %v462_v3 }
 0x132   : > { %v479_v14 = vmax.f32 %v471_v10, 0.0 }
 0x133   : > { %v478_v15 = vmax.f32 %v470_v11, 0.0  ;;  %v357_v16 = vpop.xlane.xlu1 %356 }
 0x134   : > { %v354_v17 = vpop.xlane.xlu0 %353  ;;  %v487_v18 = vadd.f32 1e-05, %v479_v14  ;;  %v369_v46 = vadd.f32 %v357_v16, %v333_v6 }
 0x135   : > { %v486_v19 = vadd.f32 1e-05, %v478_v15  ;;  %v368_v47 = vadd.f32 %v354_v17, %v330_v7 }
 0x136   : > { %1131 = vrsqrt.f32 %v487_v18  ;;  %v449_v50 = vmul.f32 0.0078125, %v369_v46 }
 0x137   : > { %1133 = vrsqrt.f32 %v486_v19  ;;  %v339_v20 = vpop.xlane.xlu1 %338  ;;  %v448_v55 = vmul.f32 0.0078125, %v368_v47 }
 0x138   : > { %v336_v21 = vpop.xlane.xlu0 %335  ;;  %v1128_v24 = vpop.eup %1127  ;;  %v465_v62 = vmul.f32 %v449_v50, %v449_v50 }
 0x139   : > { %v1130_v27 = vpop.eup %1129  ;;  %v516_v30 = vmul.f32 %v1128_v24, %v508_v22  ;;  %v653_v31 = vmul.f32 %v1128_v24, %v645_v23  ;;  %v464_v9 = vmul.f32 %v448_v55, %v448_v55  ;;  %v648_v46 = vsub.f32 %v1671_v37, %v448_v55 }
 0x13a   : > { %v515_v34 = vmul.f32 %v1130_v27, %v507_v25  ;;  %v652_v35 = vmul.f32 %v1130_v27, %v644_v26 }
 0x13b   : > { %v363_v38 = vpop.xlane.xlu1 %362 }
 0x13c   : > { %v360_v39 = vpop.xlane.xlu0 %359  ;;  %v523_v42 = vpack.c.bf16 %v516_v30, %v515_v34  ;;  %v660_v43 = vpack.c.bf16 %v653_v31, %v652_v35  ;;  %v371_v52 = vadd.f32 %v363_v38, %v339_v20  ;;  %v512_v38 = vsub.f32 %v1658_v32, %v449_v50 }
 0x13d   : > { %v370_v63 = vadd.f32 %v360_v39, %v336_v21  ;;  %v649_v39 = vsub.f32 %v1668_v36, %v449_v50 }
 0x13e   : > { %994 = vmatprep.mubr.msk.bf16.mxu1 %vm315_vm0, %v523_v42  ;;  %1010 = vmatprep.mubr.msk.bf16.mxu0 %vm315_vm0, %v660_v43  ;;  %v451_v10 = vmul.f32 0.0078125, %v371_v52  ;;  %v511_v43 = vsub.f32 %v1661_v33, %v448_v55 }
 0x13f   : > { %v397_v0 = vpop.xlane.xlu1 %396  ;;  %v450_v11 = vmul.f32 0.0078125, %v370_v63 }
 0x140   : > { %v394_v5 = vpop.xlane.xlu0 %393  ;;  %v1132_v28 = vpop.eup %1131  ;;  %v467_v22 = vmul.f32 %v451_v10, %v451_v10  ;;  %v514_v32 = vsub.f32 %v1678_v40, %v451_v10  ;;  %v651_v36 = vsub.f32 %v1688_v44, %v451_v10  ;;  %v945_v40 = vld [vmem:[%s1807_s3] ss:$0 sm:$0xff] }
 0x141   : > { %v1134_v49 = vpop.eup %1133  ;;  %v518_v51 = vmul.f32 %v1132_v28, %v510_v2  ;;  %v655_v54 = vmul.f32 %v1132_v28, %v647_v1  ;;  %v466_v24 = vmul.f32 %v450_v11, %v450_v11  ;;  %v513_v33 = vsub.f32 %v1681_v41, %v450_v11 }
 0x142   : > { %v517_v56 = vmul.f32 %v1134_v49, %v509_v29  ;;  %v654_v57 = vmul.f32 %v1134_v49, %v646_v48  ;;  %v650_v37 = vsub.f32 %v1691_v45, %v450_v11 }
 0x143   : > { %v429_v58 = vpop.xlane.xlu1 %428 }
 0x144   : > { %v426_v59 = vpop.xlane.xlu0 %425  ;;  %v441_v60 = vadd.f32 %v429_v58, %v397_v0  ;;  %v524_v61 = vpack.c.bf16 %v518_v51, %v517_v56  ;;  %v661_v12 = vpack.c.bf16 %v655_v54, %v654_v57 }
 0x145   : > { %v440_v8 = vadd.f32 %v426_v59, %v394_v5 }
 0x146   : > { %v457_v3 = vmul.f32 0.0078125, %v441_v60  ;;  %995 = vmatmul.mubr.msk.bf16.vlgmr.msra.gmra.mrb[0].mxu1 %vm315_vm0, %v524_v61  ;;  %1011 = vmatmul.mubr.msk.bf16.vlgmr.msra.gmra.mrb[0].mxu0 %vm315_vm0, %v661_v12 }
 0x147   : > { %v456_v4 = vmul.f32 0.0078125, %v440_v8  ;;  %v403_v13 = vpop.xlane.xlu1 %402 }
 0x148   : > { %v400_v53 = vpop.xlane.xlu0 %399  ;;  %v473_v6 = vsub.f32 %v457_v3, %v465_v62 }
 0x149   : > { %v472_v7 = vsub.f32 %v456_v4, %v464_v9 }
 0x14a   : > { %v481_v14 = vmax.f32 %v473_v6, 0.0 }
 0x14b   : > { %v480_v15 = vmax.f32 %v472_v7, 0.0  ;;  %v435_v16 = vpop.xlane.xlu1 %434 }
 0x14c   : > { %v432_v17 = vpop.xlane.xlu0 %431  ;;  %v489_v18 = vadd.f32 1e-05, %v481_v14  ;;  %v443_v20 = vadd.f32 %v435_v16, %v403_v13 }
 0x14d   : > { %v488_v19 = vadd.f32 1e-05, %v480_v15  ;;  %v442_v21 = vadd.f32 %v432_v17, %v400_v53 }
 0x14e   : > { %1135 = vrsqrt.f32 %v489_v18  ;;  %v459_v23 = vmul.f32 0.0078125, %v443_v20 }
 0x14f   : > { %v458_v25 = vmul.f32 0.0078125, %v442_v21  ;;  %1137 = vrsqrt.f32 %v488_v19 }
 0x150   : > { %v475_v26 = vsub.f32 %v459_v23, %v467_v22 }
 0x151   : > { %v474_v27 = vsub.f32 %v458_v25, %v466_v24 }
 0x152   : > { %v483_v30 = vmax.f32 %v475_v26, 0.0 }
 0x153   : > { %v482_v31 = vmax.f32 %v474_v27, 0.0 }
 0x154   : > { %v491_v34 = vadd.f32 1e-05, %v483_v30 }
 0x155   : > { %v490_v35 = vadd.f32 1e-05, %v482_v31 }
 0x156   : > { %1139 = vrsqrt.f32 %v491_v34 }
 0x157   : > { %1141 = vrsqrt.f32 %v490_v35 }
 0x158   : > { %v1136_v42 = vpop.eup %1135 }
 0x159   : > { %v1138_v47 = vpop.eup %1137  ;;  %v520_v2 = vmul.f32 %v1136_v42, %v512_v38  ;;  %v657_v1 = vmul.f32 %v1136_v42, %v649_v39 }
 0x15a   : > { %v519_v0 = vmul.f32 %v1138_v47, %v511_v43  ;;  %v656_v5 = vmul.f32 %v1138_v47, %v648_v46 }
 0x15c   : > { %v525_v28 = vpack.c.bf16 %v520_v2, %v519_v0  ;;  %v662_v29 = vpack.c.bf16 %v657_v1, %v656_v5 }
 0x15e   : > { %998 = vmatprep.mubr.msk.bf16.mxu1 %vm315_vm0, %v525_v28  ;;  %1014 = vmatprep.mubr.msk.bf16.mxu0 %vm315_vm0, %v662_v29 }
 0x160   : > { %v1140_v48 = vpop.eup %1139 }
 0x161   : > { %v1142_v49 = vpop.eup %1141  ;;  %v522_v50 = vmul.f32 %v1140_v48, %v514_v32  ;;  %v659_v51 = vmul.f32 %v1140_v48, %v651_v36 }
 0x162   : > { %v521_v54 = vmul.f32 %v1142_v49, %v513_v33  ;;  %v658_v55 = vmul.f32 %v1142_v49, %v650_v37 }
 0x164   : > { %v526_v56 = vpack.c.bf16 %v522_v50, %v521_v54  ;;  %v663_v57 = vpack.c.bf16 %v659_v51, %v658_v55 }
 0x166   : > { %999 = vmatmul.mubr.msk.bf16.gmra.mrb[4].mxu1 %vm315_vm0, %v526_v56  ;;  %1015 = vmatmul.mubr.msk.bf16.gmra.mrb[4].mxu0 %vm315_vm0, %v663_v57 }
 0x219   : > { %v996_v44 = vpop.f32.mrb[0].mxu1  ;;  %v1012_v41 = vpop.f32.mrb[0].mxu0 }
 0x21a   : > { %v638_v58 = vadd.f32 %v996_v44, %v945_v40  ;;  %v605_v45 = vpop.f32.mrb[1].mxu1  ;;  %v743_v59 = vpop.f32.mrb[1].mxu0 }
 0x21b   : > { %v636_v60 = vadd.f32 %v945_v40, %v605_v45  ;;  %v997_v8 = vpop.f32.mrb[2].mxu1  ;;  %v1013_v61 = vpop.f32.mrb[2].mxu0 }
 0x21c   : > { %v776_v12 = vadd.f32 %v1012_v41, %v638_v58  ;;  %v639_v52 = vadd.f32 %v997_v8, %v945_v40  ;;  %v608_v62 = vpop.f32.mrb[3].mxu1  ;;  %v746_v63 = vpop.f32.mrb[3].mxu0 }
 0x21d   : > { %v774_v3 = vadd.f32 %v743_v59, %v636_v60  ;;  %v637_v9 = vadd.f32 %v945_v40, %v608_v62 }
 0x21e   : > { %784 = vst [vmem:[%s294_s11 + $0x10] sm:$0xff] %v776_v12  ;;  %v777_v4 = vadd.f32 %v1013_v61, %v639_v52 }
 0x21f   : > { %782 = vst [vmem:[%s294_s11] sm:$0xff] %v774_v3  ;;  %v775_v13 = vadd.f32 %v746_v63, %v637_v9 }
 0x220   : > { %785 = vst [vmem:[%s294_s11 + $0x18] sm:$0xff] %v777_v4 }
 0x221   : > { %783 = vst [vmem:[%s294_s11 + $0x8] sm:$0xff] %v775_v13 }
 0x239   : > { %v1000_v53 = vpop.f32.mrb[4].mxu1  ;;  %v1016_v6 = vpop.f32.mrb[4].mxu0 }
 0x23a   : > { %v642_v7 = vadd.f32 %v1000_v53, %v945_v40  ;;  %v621_v10 = vpop.f32.mrb[5].mxu1  ;;  %v759_v11 = vpop.f32.mrb[5].mxu0 }
 0x23b   : > { %v640_v14 = vadd.f32 %v945_v40, %v621_v10  ;;  %v1001_v15 = vpop.f32.mrb[6].mxu1  ;;  %v1017_v16 = vpop.f32.mrb[6].mxu0 }
 0x23c   : > { %v780_v17 = vadd.f32 %v1016_v6, %v642_v7  ;;  %v643_v18 = vadd.f32 %v1001_v15, %v945_v40  ;;  %v624_v19 = vpop.f32.mrb[7].mxu1  ;;  %v762_v20 = vpop.f32.mrb[7].mxu0 }
 0x23d   : > { %v778_v21 = vadd.f32 %v759_v11, %v640_v14  ;;  %v641_v22 = vadd.f32 %v945_v40, %v624_v19 }
 0x23e   : > { %788 = vst [vmem:[%s294_s11 + $0x30] sm:$0xff] %v780_v17  ;;  %v781_v23 = vadd.f32 %v1017_v16, %v643_v18 }
 0x23f   : > { %786 = vst [vmem:[%s294_s11 + $0x20] sm:$0xff] %v778_v21  ;;  %v779_v24 = vadd.f32 %v762_v20, %v641_v22 }
 0x240   : > { %789 = vst [vmem:[%s294_s11 + $0x38] sm:$0xff] %v781_v23 }
 0x241   : > { %787 = vst [vmem:[%s294_s11 + $0x28] sm:$0xff] %v779_v24 }
 0x242   : > { %1245 = shalt.err (!%p1242_p10)
}
 0x243   : > { %s1246_s13 = scalar_lea.hbm %s1755_s10, 1024  ;;  %s1250_s6 = scalar_lea.hbm %s1808_s4, 2048 }
 0x244   : > { %p1247_p13 = scmp.ne.s32.totalorder %s1755_s10, %s1246_s13  ;;  %p1251_p11 = scmp.lt.u32.totalorder %s1755_s10, %s1808_s4 }
 0x245   : > { %p1252_p9 = scmp.lt.u32.totalorder %s1250_s6, %s1246_s13  ;;  %p1254_p3 = scmp.lt.u32.totalorder %s1246_s13, %s1755_s10 }
 0x246   : > { %p1248_p5 = pnand %p1247_p13, %p1840_p7 }
 0x247   : > { %p1253_p1 = por %p1252_p9, %p1251_p11 }
 0x248   : > { %p1249_p12 = pneg %p1248_p5 }
 0x249   : > { %p1255_p8 = por %p1254_p3, %p1253_p1 }
 0x24b   : > { %p1256_p0 = pnand %p1255_p8, %p1249_p12 }
 0x24d   : > { %1259 = shalt.err (!%p1256_p0)
}
 0x24e   : > { %s1333_s28 = smov 128   ;;  %s1334_s9 = smov 8  }
 0x24f   : > { %1042 = dma.vmem_to_hbm [thread:$0]  (%p1840_p7), %s1750_s24, 1024, %s1755_s10, %s791_s18, %s1333_s28, %s1333_s28, %s1334_s9  }
 0x250 PF: > { %s821_s21 = sand.u32 1, %s1302_s15   ;;  %p1841_p4 = scmp.ne.s32.totalorder %s1823_s27, 0 }
 0x251   : > { %p1842_p6 = scmp.ge.s32.totalorder %s1322_s20, 2  ;;  %s822_s25 = scalar_lea.sflag [#allocation4], %s821_s21 }
 0x253   : > { %p1056_p2 = pnand %p1842_p6, %p1841_p4 }
 0x255   : > { %1297 = dma.done.wait (!%p1056_p2), %s822_s25, 1024  }
 0x256   : > { %1299 = vsyncadd (!%p1056_p2), %s822_s25, 4294966272  ;;  %s23_s20 = sadd.s32 1, %s1322_s20   ;;  %s1843_s11 = sld [smem:[#allocation13_spill]] }
 0x257   : > { %p20_p10 = scmp.ge.s32.totalorder %s23_s20, 4   ;;  %s1844_s17 = sld [smem:[#allocation15_spill]] }
 0x258   : > { %s1845_s26 = sld [smem:[#allocation14_spill]]  ;;  %s1846_s15 = smov %s1306_s16 }
 0x259   : > { %s1848_s18 = smov %s1318_s19  ;;  %22 = sbr.rel (!%p20_p10) target bundleno = 11 (0xb), region = 99 }
 0x25c   : > { %s1847_s16 = smov %s1843_s11 }
 0x25e   : > { %s1849_s19 = smov %s1845_s26 }
 0x260   :  { %827 = vsyncpa [#allocation3], 1 }
 0x261   :  { %829 = vsyncpa [#allocation3 + $0x1], 1 }
 0x262   :  { %830 = vsyncpa [#allocation6], 1 }
 0x263   :  { %832 = vsyncpa [#allocation6 + $0x1], 1 }
 0x264   :  { %833 = vsyncpa [#allocation4], 1 }
 0x265   :  { %835 = vsyncpa [#allocation4 + $0x1], 1 }

</bundles_post_ra>
